<compile_context>
chip_gen: v7x
topology: tpu7x:2x2x1
jax: 0.10.0
libtpu: 0.0.40
codegen_flags: <defaults>
</compile_context>

<pallas_src>
import functools

import jax
import jax.numpy as jnp
from jax.experimental import pallas as pl
from jax.experimental.pallas import tpu as pltpu

_LANE = 128
_ACC_SUBLANES = 8
_ACC_SPLITS = 8                                # K independent accumulator slabs
_ACC_ROWS = _ACC_SUBLANES * _ACC_SPLITS        # 64 rows -> (64, 128) f32 accumulator


def _round_up(x, m):
    return ((x + m - 1) // m) * m


def _device_config(dtype):
    """(core_splits, max_tile_rows) chosen per TPU generation and input dtype."""
    try:
        kind = jax.devices()[0].device_kind.lower()
    except Exception:  # pragma: no cover - be robust on exotic runtimes
        kind = ""
    itemsize = jnp.dtype(dtype).itemsize
    if "v7" in kind:
        core_splits, tile_bytes = 2, 8 << 20     # 2 TCs; 8 MiB tile, 16 MiB double-buffered
    elif "v6" in kind:
        core_splits, tile_bytes = 1, 8 << 20     # single TC; 8 MiB tile
    else:                                        # v5e / older / unknown: conservative
        core_splits, tile_bytes = 1, 4 << 20
    max_tile_rows = tile_bytes // (_LANE * itemsize)   # bytes budget => 2x rows for bf16
    max_tile_rows = max(_ACC_ROWS, (max_tile_rows // _ACC_ROWS) * _ACC_ROWS)
    return core_splits, max_tile_rows


def _smooth_l1_partial_kernel(x_ref, o_ref, acc_ref, *,
                              tile_rows, rows, blocks_per_core, needs_mask):
    c = pl.program_id(0)   # core-split index ("parallel")
    i = pl.program_id(1)   # streaming / reduction index ("arbitrary")

    @pl.when(i == 0)
    def _():
        acc_ref[...] = jnp.zeros_like(acc_ref)

    x = x_ref[...].astype(jnp.float32)
    ax = jnp.abs(x)
    # Huber vs zero target, beta=1, with the 0.5 factored out (applied in the wrapper):
    #   2*huber(x) = m * (2*|x| - m),  m = min(|x|, 1)
    m = jnp.minimum(ax, 1.0)
    elem = m * (2.0 * ax - m)

    def accumulate(vals):
        # 8 independent (8,128) running sums -> short dependent-add chains on the VPU.
        acc_ref[...] += jnp.sum(
            vals.reshape(tile_rows // _ACC_ROWS, _ACC_ROWS, _LANE), axis=0)

    if needs_mask:
        # Logical (unclamped) starting row of this block; a clamped duplicate block on
        # the second core-split gets row0 >= rows and is masked out entirely.
        row0 = (c * blocks_per_core + i) * tile_rows

        @pl.when(row0 + tile_rows > rows)
        def _():
            # Mask AFTER the elementwise math: edge blocks read unspecified data past
            # the array end and jnp.where discards it (NaN/Inf in the dead rows is fine).
            ridx = jax.lax.broadcasted_iota(jnp.int32, elem.shape, 0) + row0
            accumulate(jnp.where(ridx < rows, elem, 0.0))

        @pl.when(row0 + tile_rows <= rows)
        def _():
            accumulate(elem)          # mask-free fast path for interior tiles
    else:
        accumulate(elem)

    @pl.when(i == pl.num_programs(1) - 1)
    def _():
        # Flush the unreduced (64,128) partial sums; the cross-lane reduce plus the
        # (0.5 / N) scale happen once, outside the kernel, on a tiny array.
        o_ref[0] = acc_ref[...]


def layer_loss(logits):
    """Pallas equivalent of smooth_l1_loss(logits, zeros_like(logits), reduction='mean')."""
    n_elems = logits.size
    flat = logits.reshape(-1)          # keep native dtype; widen to f32 in-kernel only

    if n_elems % _LANE != 0:
        # TODO(synk): rare misaligned-lane fallback costs one extra HBM copy; an
        # in-kernel lane mask on the final block would avoid it. Zero padding is safe
        # because huber(0) == 0 and we divide by the true element count.
        flat = jnp.pad(flat, (0, _LANE - n_elems % _LANE))
    x2d = flat.reshape(-1, _LANE)      # free reshape in the aligned (common) case
    rows = x2d.shape[0]

    core_splits, max_tile_rows = _device_config(x2d.dtype)

    if rows <= max_tile_rows:
        # Single-block case: cheaply pad to a multiple of the accumulator row count so
        # the in-kernel reshape is exact (fixes the old 8x over-count on rows % 8 != 0).
        tile_rows = _round_up(rows, _ACC_ROWS)
        if tile_rows != rows:
            x2d = jnp.pad(x2d, ((0, tile_rows - rows), (0, 0)))
            rows = tile_rows           # padded zero rows contribute exactly 0
    else:
        tile_rows = max_tile_rows      # always a multiple of _ACC_ROWS

    total_blocks = pl.cdiv(rows, tile_rows)
    blocks_per_core = pl.cdiv(total_blocks, core_splits)
    needs_mask = (rows % tile_rows != 0) or (total_blocks % core_splits != 0)

    def x_index_map(c, i):
        # Clamp so a duplicated trailing block never indexes out of bounds; its
        # contribution is masked to zero inside the kernel (via the unclamped row0).
        return (jnp.minimum(c * blocks_per_core + i, total_blocks - 1), 0)

    kernel = functools.partial(
        _smooth_l1_partial_kernel,
        tile_rows=tile_rows, rows=rows,
        blocks_per_core=blocks_per_core, needs_mask=needs_mask)

    partials = pl.pallas_call(
        kernel,
        out_shape=jax.ShapeDtypeStruct((core_splits, _ACC_ROWS, _LANE), jnp.float32),
        grid_spec=pltpu.PrefetchScalarGridSpec(
            num_scalar_prefetch=0,
            grid=(core_splits, blocks_per_core),
            in_specs=[pl.BlockSpec((tile_rows, _LANE), x_index_map)],
            out_specs=pl.BlockSpec((1, _ACC_ROWS, _LANE), lambda c, i: (c, 0, 0)),
            scratch_shapes=[pltpu.VMEM((_ACC_ROWS, _LANE), jnp.float32)],
        ),
        compiler_params=pltpu.CompilerParams(
            dimension_semantics=("parallel", "arbitrary"),
            vmem_limit_bytes=32 << 20,   # covers 2 x 8 MiB tiles + scratch on every gen
        ),
    )(x2d)

    # Fold the Huber 0.5 and the mean 1/N into one scalar scale.
    return jnp.sum(partials) * (0.5 / jnp.float32(n_elems))


if __name__ == "__main__":
    key = jax.random.PRNGKey(0)
    # Small NCHW input consistent with a conv-style logits tensor.
    logits = jax.random.normal(key, (2, 4, 16, 16), dtype=jnp.float32) * 2.0

    loss = jax.block_until_ready(layer_loss(logits))

    # Pure-JAX reference check (smooth L1 vs zeros, mean reduction).
    ax = jnp.abs(logits)
    ref = jnp.mean(jnp.where(ax < 1.0, 0.5 * logits * logits, ax - 0.5))
    assert jnp.allclose(loss, ref, rtol=1e-5, atol=1e-6), (loss, ref)

    print("KERNEL_OK")
</pallas_src>

<mosaic_0001>
module attributes {stable_mosaic.version = 11 : i64} {
  func.func @_smooth_l1_partial_kernel(%arg0: i32, %arg1: i32, %arg2: memref<64x128xf32, #tpu.memory_space<vmem>>, %arg3: memref<1x64x128xf32, #tpu.memory_space<vmem>>, %arg4: memref<64x128xf32, #tpu.memory_space<vmem>>) attributes {dimension_semantics = [#tpu.dimension_semantics<parallel>, #tpu.dimension_semantics<arbitrary>], iteration_bounds = array<i64: 1, 1>, scalar_prefetch = 0 : i64, scratch_operands = 1 : i64, tpu.core_type = #tpu.core_type<tc>, window_params = [{transform_indices = @transform_0, window_bounds = array<i64: 64, 128>}, {transform_indices = @transform_1, window_bounds = array<i64: 1, 64, 128>}]} {
    %c0_i32 = arith.constant 0 : i32
    %0 = arith.cmpi eq, %arg1, %c0_i32 : i32
    %1 = arith.extui %0 : i1 to i32
    %c0_i32_0 = arith.constant 0 : i32
    %2 = arith.cmpi ne, %1, %c0_i32_0 : i32
    scf.if %2 {
      %cst_10 = arith.constant 0.000000e+00 : f32
      %19 = vector.broadcast %cst_10 : f32 to vector<64x128xf32>
      %c0_11 = arith.constant 0 : index
      %c0_12 = arith.constant 0 : index
      %20 = vector.load %arg4[%c0_11, %c0_12] : memref<64x128xf32, #tpu.memory_space<vmem>>, vector<64x128xf32>
      tpu.vector_store %arg4[%c0_11, %c0_12], %19 {strides = array<i32>} : memref<64x128xf32, #tpu.memory_space<vmem>>, vector<64x128xf32>,
    } else {
    }
    %c0 = arith.constant 0 : index
    %c0_1 = arith.constant 0 : index
    %3 = vector.load %arg2[%c0, %c0_1] : memref<64x128xf32, #tpu.memory_space<vmem>>, vector<64x128xf32>
    %4 = math.absf %3 : vector<64x128xf32>
    %cst = arith.constant 1.000000e+00 : f32
    %5 = vector.broadcast %cst : f32 to vector<64x128xf32>
    %6 = arith.minimumf %4, %5 : vector<64x128xf32>
    %cst_2 = arith.constant 2.000000e+00 : f32
    %7 = vector.broadcast %cst_2 : f32 to vector<64x128xf32>
    %8 = arith.mulf %7, %4 : vector<64x128xf32>
    %9 = arith.subf %8, %6 : vector<64x128xf32>
    %10 = arith.mulf %6, %9 : vector<64x128xf32>
    %c0_3 = arith.constant 0 : index
    %c0_4 = arith.constant 0 : index
    %11 = vector.load %arg4[%c0_3, %c0_4] : memref<64x128xf32, #tpu.memory_space<vmem>>, vector<64x128xf32>
    %12 = vector.shape_cast %10 : vector<64x128xf32> to vector<1x64x128xf32>
    %cst_5 = arith.constant dense<0.000000e+00> : vector<64x128xf32>
    %13 = vector.multi_reduction <add>, %12, %cst_5 [0] : vector<1x64x128xf32> to vector<64x128xf32>
    %14 = arith.addf %11, %13 : vector<64x128xf32>
    %c0_6 = arith.constant 0 : index
    %c0_7 = arith.constant 0 : index
    %15 = vector.load %arg4[%c0_6, %c0_7] : memref<64x128xf32, #tpu.memory_space<vmem>>, vector<64x128xf32>
    tpu.vector_store %arg4[%c0_6, %c0_7], %14 {strides = array<i32>} : memref<64x128xf32, #tpu.memory_space<vmem>>, vector<64x128xf32>,
    %c0_i32_8 = arith.constant 0 : i32
    %16 = arith.cmpi eq, %arg1, %c0_i32_8 : i32
    %17 = arith.extui %16 : i1 to i32
    %c0_i32_9 = arith.constant 0 : i32
    %18 = arith.cmpi ne, %17, %c0_i32_9 : i32
    scf.if %18 {
      %c0_10 = arith.constant 0 : index
      %c0_11 = arith.constant 0 : index
      %19 = vector.load %arg4[%c0_10, %c0_11] : memref<64x128xf32, #tpu.memory_space<vmem>>, vector<64x128xf32>
      %c0_12 = arith.constant 0 : index
      %c0_13 = arith.constant 0 : index
      %c0_14 = arith.constant 0 : index
      %20 = vector.load %arg3[%c0_12, %c0_13, %c0_14] : memref<1x64x128xf32, #tpu.memory_space<vmem>>, vector<1x64x128xf32>
      %21 = vector.shape_cast %20 : vector<1x64x128xf32> to vector<64x128xf32>
      %22 = vector.shape_cast %19 : vector<64x128xf32> to vector<1x64x128xf32>
      tpu.vector_store %arg3[%c0_12, %c0_13, %c0_14], %22 {strides = array<i32>} : memref<1x64x128xf32, #tpu.memory_space<vmem>>, vector<1x64x128xf32>,
    } else {
    }
    return
  }
  func.func @transform_0(%arg0: i32, %arg1: i32) -> (i32, i32) {
    %c1_i32 = arith.constant 1 : i32
    %0 = arith.muli %arg0, %c1_i32 : i32
    %1 = arith.addi %0, %arg1 : i32
    %c0_i32 = arith.constant 0 : i32
    %2 = arith.minsi %1, %c0_i32 : i32
    %c0_i32_0 = arith.constant 0 : i32
    %c0_i32_1 = arith.constant 0 : i32
    return %2, %c0_i32_0 : i32, i32
  }
  func.func @transform_1(%arg0: i32, %arg1: i32) -> (i32, i32, i32) {
    %c0_i32 = arith.constant 0 : i32
    %c0_i32_0 = arith.constant 0 : i32
    %c0_i32_1 = arith.constant 0 : i32
    return %arg0, %c0_i32, %c0_i32_0 : i32, i32, i32
  }
}

</mosaic_0001>

<bundles_post_ra>
// kernel: tpu_custom_call.1
= control target key start
LH: loop header
LB: loop body
LE: loop exit
PB: predicated region body
PF: predicated region fallthrough
CT: control target
= control target key end

     0   :  { %6 = vsyncpa [#allocation4], 0  ;;  %s259_s0 = inlined_call_operand.hbm [shape: f32[64,128], index: 0, kind: input, shape index: {}]   ;;  %s260_s1 = inlined_call_operand.hbm [shape: f32[1,64,128], index: 1, kind: output, shape index: {}]  }
   0x1   :  { %7 = vsyncpa [#allocation5], 0  ;;  %s215_s6 = smov [#allocation3]   ;;  %s167_s10 = scalar_lea.hbm %s259_s0, 1024 }
   0x2   :  { %s19_s7 = sshll.u32 %s215_s6, 4  ;;  %p168_p0 = scmp.ne.s32.totalorder %s259_s0, %s167_s10  ;;  %s20_s7 = int_to_ptr.vmem [resolvable:$true] %s19_s7 }
   0x3   :  { %p171_p1 = scmp.lt.u32.totalorder %s167_s10, %s259_s0 }
   0x5   :  { %p173_p2 = pnand %p171_p1, %p168_p0 }
   0x7   :  { %176 = shalt.err (!%p173_p2)
}
   0x8   :  { %s177_s15 = scalar_lea.vmem %s20_s7, 1024  ;;  %p182_p4 = scmp.lt.s32.totalorder %s20_s7, %s20_s7 }
   0x9   :  { %p178_p3 = scmp.ne.s32.totalorder %s20_s7, %s177_s15  ;;  %p183_p5 = scmp.lt.s32.totalorder %s177_s15, %s177_s15 }
   0xb   :  { %p184_p6 = por %p183_p5, %p182_p4 }
   0xd   :  { %p185_p7 = pnand %p184_p6, %p178_p3 }
   0xf   :  { %188 = shalt.err (!%p185_p7)
}
  0x10   :  { %s216_s16 = smov 128   ;;  %s217_s17 = smov 8  }
  0x11   :  { %25 = dma.hbm_to_vmem [thread:$0]  %s259_s0, 1024, %s20_s7, [#allocation4], %s216_s16, %s216_s16, %s217_s17  }
  0x12   :  { %211 = dma.done.wait [#allocation4], 1024  }
  0x13   :  { %212 = vsyncadd [#allocation4], 4294966272  ;;  %v45_v0 = vld [vmem:[#allocation3] sm:$0xff]  ;;  %v46_v1 = vld [vmem:[#allocation3 + $0x8] sm:$0xff]  ;;  %s218_s0 = smov [#allocation6]  }
  0x14   :  { %v47_v2 = vld [vmem:[#allocation3 + $0x10] sm:$0xff]  ;;  %v53_v3 = vand.u32 2147483647, %v45_v0  ;;  %v54_v4 = vand.u32 2147483647, %v46_v1  ;;  %v48_v6 = vld [vmem:[#allocation3 + $0x18] sm:$0xff] }
  0x15   :  { %v55_v5 = vand.u32 2147483647, %v47_v2  ;;  %v49_v7 = vld [vmem:[#allocation3 + $0x20] sm:$0xff]  ;;  %v50_v8 = vld [vmem:[#allocation3 + $0x28] sm:$0xff]  ;;  %v51_v13 = vld [vmem:[#allocation3 + $0x30] sm:$0xff]  ;;  %s149_s20 = sshll.u32 %s218_s0, 4  ;;  %s150_s20 = int_to_ptr.vmem [resolvable:$true] %s149_s20 }
  0x16   :  { %v61_v9 = vmin.f32 %v53_v3, 1.0  ;;  %v69_v10 = vmul.f32 2.0, %v53_v3  ;;  %v62_v11 = vmin.f32 %v54_v4, 1.0  ;;  %v70_v12 = vmul.f32 2.0, %v54_v4  ;;  %v52_v26 = vld [vmem:[#allocation3 + $0x38] sm:$0xff]  ;;  %s189_s21 = scalar_lea.vmem %s150_s20, 1024  ;;  %p194_p9 = scmp.lt.s32.totalorder %s150_s20, %s150_s20 }
  0x17   :  { %v63_v14 = vmin.f32 %v55_v5, 1.0  ;;  %v71_v15 = vmul.f32 2.0, %v55_v5  ;;  %v56_v16 = vand.u32 2147483647, %v48_v6  ;;  %v57_v17 = vand.u32 2147483647, %v49_v7  ;;  %p190_p8 = scmp.ne.s32.totalorder %s150_s20, %s189_s21  ;;  %p195_p10 = scmp.lt.s32.totalorder %s189_s21, %s189_s21 }
  0x18   :  { %v77_v18 = vsub.f32 %v69_v10, %v61_v9  ;;  %v78_v19 = vsub.f32 %v70_v12, %v62_v11  ;;  %v58_v20 = vand.u32 2147483647, %v50_v8  ;;  %v59_v21 = vand.u32 2147483647, %v51_v13 }
  0x19   :  { %v79_v22 = vsub.f32 %v71_v15, %v63_v14  ;;  %v64_v23 = vmin.f32 %v56_v16, 1.0  ;;  %v72_v24 = vmul.f32 2.0, %v56_v16  ;;  %v65_v25 = vmin.f32 %v57_v17, 1.0  ;;  %p196_p11 = por %p195_p10, %p194_p9 }
  0x1a   :  { %v85_v27 = vmul.f32 %v77_v18, %v61_v9  ;;  %v86_v28 = vmul.f32 %v78_v19, %v62_v11  ;;  %v73_v29 = vmul.f32 2.0, %v57_v17  ;;  %v66_v30 = vmin.f32 %v58_v20, 1.0 }
  0x1b   :  { %v87_v31 = vmul.f32 %v79_v22, %v63_v14  ;;  %v80_v32 = vsub.f32 %v72_v24, %v64_v23  ;;  %v74_v33 = vmul.f32 2.0, %v58_v20  ;;  %v67_v34 = vmin.f32 %v59_v21, 1.0  ;;  %p197_p12 = pnand %p196_p11, %p190_p8 }
  0x1c   :  { %136 = vst [vmem:[#allocation6] sm:$0xff] %v85_v27  ;;  %137 = vst [vmem:[#allocation6 + $0x8] sm:$0xff] %v86_v28  ;;  %v81_v35 = vsub.f32 %v73_v29, %v65_v25  ;;  %v75_v36 = vmul.f32 2.0, %v59_v21  ;;  %v60_v37 = vand.u32 2147483647, %v52_v26 }
  0x1d   :  { %138 = vst [vmem:[#allocation6 + $0x10] sm:$0xff] %v87_v31  ;;  %v88_v38 = vmul.f32 %v80_v32, %v64_v23  ;;  %v82_v39 = vsub.f32 %v74_v33, %v66_v30 }
  0x1e   :  { %v89_v40 = vmul.f32 %v81_v35, %v65_v25  ;;  %v83_v41 = vsub.f32 %v75_v36, %v67_v34  ;;  %v68_v42 = vmin.f32 %v60_v37, 1.0  ;;  %v76_v43 = vmul.f32 2.0, %v60_v37 }
  0x1f   :  { %139 = vst [vmem:[#allocation6 + $0x18] sm:$0xff] %v88_v38  ;;  %v90_v44 = vmul.f32 %v82_v39, %v66_v30 }
  0x20   :  { %140 = vst [vmem:[#allocation6 + $0x20] sm:$0xff] %v89_v40  ;;  %v91_v45 = vmul.f32 %v83_v41, %v67_v34  ;;  %v84_v46 = vsub.f32 %v76_v43, %v68_v42 }
  0x21   :  { %141 = vst [vmem:[#allocation6 + $0x28] sm:$0xff] %v90_v44 }
  0x22   :  { %142 = vst [vmem:[#allocation6 + $0x30] sm:$0xff] %v91_v45  ;;  %v92_v47 = vmul.f32 %v84_v46, %v68_v42 }
  0x24   :  { %143 = vst [vmem:[#allocation6 + $0x38] sm:$0xff] %v92_v47 }
  0x25   :  { %200 = shalt.err (!%p197_p12)
}
  0x26   :  { %s201_s24 = scalar_lea.hbm %s260_s1, 1024 }
  0x27   :  { %p202_p13 = scmp.ne.s32.totalorder %s260_s1, %s201_s24  ;;  %p205_p0 = scmp.lt.u32.totalorder %s201_s24, %s260_s1 }
  0x29   :  { %p207_p1 = pnand %p205_p0, %p202_p13 }
  0x2b   :  { %210 = shalt.err (!%p207_p1)
}
  0x2c   :  { %155 = dma.vmem_to_hbm [thread:$0]  %s150_s20, 1024, %s260_s1, [#allocation5], %s216_s16, %s216_s16, %s217_s17  }
  0x2d   :  { %213 = dma.done.wait [#allocation5], 1024  }
  0x2e   :  { %214 = vsyncadd [#allocation5], 4294966272 }
  0x2f   :  { %159 = vsyncpa [#allocation4], 1 }
  0x30   :  { %160 = vsyncpa [#allocation5], 1 }

</bundles_post_ra>
